<compile_context>
chip_gen: v7x
topology: tpu7x:2x2x1
jax: 0.10.0
libtpu: 0.0.40
codegen_flags: <defaults>
</compile_context>

<pallas_src>
import jax
import jax.numpy as jnp
from jax import lax
from jax.experimental import pallas as pl
from jax.experimental.pallas import tpu as pltpu

# ----------------------------- config (matches configs['vae']) --------------
INPUT_DIM = 16
HIDDEN_DIM = 32
SECOND_HIDDEN_DIM = 16
LATENT_DIM = 8
LANE = 128            # batch lives on the 128-lane axis
BATCH = 128           # fill every lane with a real sample

# ----------------------------- packed-parameter slab layout ------------------
# Row bands (all starts are multiples of 8, so every slice is sublane-aligned).
_BAND_SIZES = (
    ("w1", HIDDEN_DIM), ("w2", SECOND_HIDDEN_DIM), ("w3", LATENT_DIM),
    ("wml", 2 * LATENT_DIM), ("wd1", HIDDEN_DIM), ("wd2", INPUT_DIM),
    ("b1", HIDDEN_DIM), ("b2", SECOND_HIDDEN_DIM), ("b3", LATENT_DIM),
    ("bml", 2 * LATENT_DIM), ("bd1", HIDDEN_DIM), ("bd2", INPUT_DIM),
)
ROW = {}
_off = 0
for _name, _n in _BAND_SIZES:
    ROW[_name] = _off
    _off += _n
SLAB_ROWS = _off          # 240 rows x 128 lanes x 4 B = 120 KiB, trivially VMEM-resident


# ----------------------------- Pallas kernel --------------------------------
def vae_kernel(x_ref, eps_ref, p_ref, out_ref):
    # x_ref:   [LANE, INPUT_DIM]   batch-major input (transpose folded into matmul #1)
    # eps_ref: [LATENT_DIM, LANE]  N(0,1) noise, already in activation layout
    # p_ref:   [SLAB_ROWS, LANE]   packed weights (cols 0:fan_in) + lane-broadcast biases
    # out_ref: [INPUT_DIM + 2*LATENT_DIM, LANE] = [x_hat ; mean ; logvar]

    def w(name, rows, cols):
        r0 = ROW[name]
        return p_ref[r0:r0 + rows, 0:cols]

    def b(name, rows):
        r0 = ROW[name]
        return p_ref[r0:r0 + rows, :]

    # encoder: Linear -> ReLU -> Linear -> ReLU -> Linear -> ReLU
    # first layer: h = W1 @ X^T, transpose folded into the contraction
    h = lax.dot_general(
        w("w1", HIDDEN_DIM, INPUT_DIM), x_ref[...],
        dimension_numbers=(((1,), (1,)), ((), ())),
        preferred_element_type=jnp.float32,
    ) + b("b1", HIDDEN_DIM)                                    # [HIDDEN_DIM, LANE]
    h = jnp.maximum(h, 0.0)

    h = jnp.dot(w("w2", SECOND_HIDDEN_DIM, HIDDEN_DIM), h,
                preferred_element_type=jnp.float32) + b("b2", SECOND_HIDDEN_DIM)
    h = jnp.maximum(h, 0.0)                                    # [SECOND_HIDDEN_DIM, LANE]

    h = jnp.dot(w("w3", LATENT_DIM, SECOND_HIDDEN_DIM), h,
                preferred_element_type=jnp.float32) + b("b3", LATENT_DIM)
    h = jnp.maximum(h, 0.0)                                    # [LATENT_DIM, LANE]

    # fused mean | logvar head: one matmul, one lane-dense slab
    ml = jnp.dot(w("wml", 2 * LATENT_DIM, LATENT_DIM), h,
                 preferred_element_type=jnp.float32) + b("bml", 2 * LATENT_DIM)
    mean = ml[:LATENT_DIM, :]                                  # [LATENT_DIM, LANE]
    logvar = ml[LATENT_DIM:, :]                                # [LATENT_DIM, LANE]

    # reparameterize: z = mean + eps * exp(0.5 * logvar)
    z = mean + eps_ref[...] * jnp.exp(0.5 * logvar)

    # decoder: Linear -> ReLU -> Linear -> Sigmoid
    d = jnp.dot(w("wd1", HIDDEN_DIM, LATENT_DIM), z,
                preferred_element_type=jnp.float32) + b("bd1", HIDDEN_DIM)
    d = jnp.maximum(d, 0.0)                                    # [HIDDEN_DIM, LANE]
    logits = jnp.dot(w("wd2", INPUT_DIM, HIDDEN_DIM), d,
                     preferred_element_type=jnp.float32) + b("bd2", INPUT_DIM)

    # fused output slab: [x_hat ; mean ; logvar], both bands 8-row aligned
    out_ref[0:INPUT_DIM, :] = jax.nn.sigmoid(logits)
    out_ref[INPUT_DIM:, :] = ml


# ----------------------------- wrapper (fully jitted) ------------------------
@jax.jit
def vae_forward(x, eps_t, param_slab):
    """x: [B, INPUT_DIM] batch-major; eps_t: [LATENT_DIM, LANE]; param_slab: packed."""
    B, D = x.shape
    assert D == INPUT_DIM and B <= LANE
    pad = LANE - B
    x_p = jnp.pad(x, ((0, pad), (0, 0))) if pad else x         # [LANE, INPUT_DIM]

    vmem = pl.BlockSpec(memory_space=pltpu.MemorySpace.VMEM)    # whole array resident
    out = pl.pallas_call(
        vae_kernel,
        in_specs=[vmem, vmem, vmem],
        out_specs=vmem,
        out_shape=jax.ShapeDtypeStruct((INPUT_DIM + 2 * LATENT_DIM, LANE), jnp.float32),
    )(x_p, eps_t, param_slab)

    x_hat = out[:INPUT_DIM, :B].T
    mean = out[INPUT_DIM:INPUT_DIM + LATENT_DIM, :B].T
    logvar = out[INPUT_DIM + LATENT_DIM:, :B].T
    return x_hat, mean, logvar


# ----------------------------- parameter init / packing ----------------------
def make_linear(key, fan_in, fan_out):
    # mirrors nn.Linear init; weight in PyTorch layout [out, in], bias [out]
    kw, kb = jax.random.split(key)
    bound = 1.0 / jnp.sqrt(float(fan_in))
    w = jax.random.uniform(kw, (fan_out, fan_in), jnp.float32, -bound, bound)
    b = jax.random.uniform(kb, (fan_out,), jnp.float32, -bound, bound)
    return w, b


def init_params(key):
    keys = jax.random.split(key, 8)
    w1, b1 = make_linear(keys[0], INPUT_DIM, HIDDEN_DIM)
    w2, b2 = make_linear(keys[1], HIDDEN_DIM, SECOND_HIDDEN_DIM)
    w3, b3 = make_linear(keys[2], SECOND_HIDDEN_DIM, LATENT_DIM)
    wm, bm = make_linear(keys[3], LATENT_DIM, LATENT_DIM)
    wl, bl = make_linear(keys[4], LATENT_DIM, LATENT_DIM)
    wd1, bd1 = make_linear(keys[5], LATENT_DIM, HIDDEN_DIM)
    wd2, bd2 = make_linear(keys[6], HIDDEN_DIM, INPUT_DIM)
    # fuse mean & logvar heads into one [2*LATENT, LATENT] matmul
    wml = jnp.concatenate([wm, wl], axis=0)
    bml = jnp.concatenate([bm, bl], axis=0)
    # NOTE: decoder_energy (Linear(latent, input)) is unused in forward(); omitted.
    return (w1, b1, w2, b2, w3, b3, wml, bml, wd1, bd1, wd2, bd2)


def pack_params(params):
    """Build the single lane-padded VMEM parameter slab (done once, reused)."""
    (w1, b1, w2, b2, w3, b3, wml, bml, wd1, bd1, wd2, bd2) = params

    def wband(w):
        out, fin = w.shape
        return jnp.pad(w, ((0, 0), (0, LANE - fin)))

    def bband(b_):
        return jnp.broadcast_to(b_.reshape(-1, 1), (b_.shape[0], LANE))

    slab = jnp.concatenate(
        [wband(w1), wband(w2), wband(w3), wband(wml), wband(wd1), wband(wd2),
         bband(b1), bband(b2), bband(b3), bband(bml), bband(bd1), bband(bd2)],
        axis=0)
    assert slab.shape == (SLAB_ROWS, LANE)
    return slab


# ----------------------------- pure-JAX reference -----------------------------
def vae_ref(x, eps, params):
    (w1, b1, w2, b2, w3, b3, wml, bml, wd1, bd1, wd2, bd2) = params
    h = jnp.maximum(x @ w1.T + b1, 0.0)
    h = jnp.maximum(h @ w2.T + b2, 0.0)
    h = jnp.maximum(h @ w3.T + b3, 0.0)
    ml = h @ wml.T + bml
    mean, logvar = ml[:, :LATENT_DIM], ml[:, LATENT_DIM:]
    z = mean + eps * jnp.exp(0.5 * logvar)
    d = jnp.maximum(z @ wd1.T + bd1, 0.0)
    x_hat = jax.nn.sigmoid(d @ wd2.T + bd2)
    return x_hat, mean, logvar


if __name__ == "__main__":
    key = jax.random.PRNGKey(0)
    kx, keps, kparam = jax.random.split(key, 3)

    x = jax.random.uniform(kx, (BATCH, INPUT_DIM), jnp.float32)
    # noise generated directly in kernel layout [LATENT_DIM, LANE] (no transpose needed)
    eps_t = jax.random.normal(keps, (LATENT_DIM, LANE), jnp.float32)

    params = init_params(kparam)
    slab = pack_params(params)          # built once, reused across calls

    x_hat, mean, logvar = vae_forward(x, eps_t, slab)
    jax.block_until_ready((x_hat, mean, logvar))

    # correctness check against pure-JAX reference (same eps, sliced to batch)
    eps = eps_t[:, :BATCH].T
    x_hat_r, mean_r, logvar_r = vae_ref(x, eps, params)
    assert jnp.allclose(x_hat, x_hat_r, atol=2e-5), "x_hat mismatch"
    assert jnp.allclose(mean, mean_r, atol=2e-5), "mean mismatch"
    assert jnp.allclose(logvar, logvar_r, atol=2e-5), "logvar mismatch"

    print("KERNEL_OK")
</pallas_src>

<mosaic_0001>
module attributes {stable_mosaic.version = 11 : i64} {
  func.func @vae_kernel(%arg0: memref<128x16xf32, #tpu.memory_space<vmem>>, %arg1: memref<8x128xf32, #tpu.memory_space<vmem>>, %arg2: memref<240x128xf32, #tpu.memory_space<vmem>>, %arg3: memref<32x128xf32, #tpu.memory_space<vmem>>) attributes {dimension_semantics = [], scalar_prefetch = 0 : i64, scratch_operands = 0 : i64, tpu.core_type = #tpu.core_type<tc>} {
    %c0 = arith.constant 0 : index
    %c0_0 = arith.constant 0 : index
    %0 = vector.load %arg2[%c0, %c0_0] : memref<240x128xf32, #tpu.memory_space<vmem>>, vector<32x16xf32>
    %c0_1 = arith.constant 0 : index
    %c0_2 = arith.constant 0 : index
    %1 = vector.load %arg0[%c0_1, %c0_2] : memref<128x16xf32, #tpu.memory_space<vmem>>, vector<128x16xf32>
    %cst = arith.constant dense<0.000000e+00> : vector<32x128xf32>
    %2 = tpu.matmul %0, %1, %cst {dimension_numbers = #tpu.dot_dimension_numbers<[1], [1], [0], [0], [0, 0, 1, 0], [], []>} : vector<32x16xf32>, vector<128x16xf32>, vector<32x128xf32> -> vector<32x128xf32>
    %c120 = arith.constant 120 : index
    %c0_3 = arith.constant 0 : index
    %3 = vector.load %arg2[%c120, %c0_3] : memref<240x128xf32, #tpu.memory_space<vmem>>, vector<32x128xf32>
    %4 = arith.addf %2, %3 : vector<32x128xf32>
    %cst_4 = arith.constant 0.000000e+00 : f32
    %5 = vector.broadcast %cst_4 : f32 to vector<32x128xf32>
    %6 = arith.maximumf %4, %5 : vector<32x128xf32>
    %c32 = arith.constant 32 : index
    %c0_5 = arith.constant 0 : index
    %7 = vector.load %arg2[%c32, %c0_5] : memref<240x128xf32, #tpu.memory_space<vmem>>, vector<16x32xf32>
    %cst_6 = arith.constant dense<0.000000e+00> : vector<16x128xf32>
    %8 = tpu.matmul %7, %6, %cst_6 {dimension_numbers = #tpu.dot_dimension_numbers<[1], [0], [0], [1], [0, 0, 1, 1], [], []>} : vector<16x32xf32>, vector<32x128xf32>, vector<16x128xf32> -> vector<16x128xf32>
    %c152 = arith.constant 152 : index
    %c0_7 = arith.constant 0 : index
    %9 = vector.load %arg2[%c152, %c0_7] : memref<240x128xf32, #tpu.memory_space<vmem>>, vector<16x128xf32>
    %10 = arith.addf %8, %9 : vector<16x128xf32>
    %cst_8 = arith.constant 0.000000e+00 : f32
    %11 = vector.broadcast %cst_8 : f32 to vector<16x128xf32>
    %12 = arith.maximumf %10, %11 : vector<16x128xf32>
    %c48 = arith.constant 48 : index
    %c0_9 = arith.constant 0 : index
    %13 = vector.load %arg2[%c48, %c0_9] : memref<240x128xf32, #tpu.memory_space<vmem>>, vector<8x16xf32>
    %cst_10 = arith.constant dense<0.000000e+00> : vector<8x128xf32>
    %14 = tpu.matmul %13, %12, %cst_10 {dimension_numbers = #tpu.dot_dimension_numbers<[1], [0], [0], [1], [0, 0, 1, 1], [], []>} : vector<8x16xf32>, vector<16x128xf32>, vector<8x128xf32> -> vector<8x128xf32>
    %c168 = arith.constant 168 : index
    %c0_11 = arith.constant 0 : index
    %15 = vector.load %arg2[%c168, %c0_11] : memref<240x128xf32, #tpu.memory_space<vmem>>, vector<8x128xf32>
    %16 = arith.addf %14, %15 : vector<8x128xf32>
    %cst_12 = arith.constant 0.000000e+00 : f32
    %17 = vector.broadcast %cst_12 : f32 to vector<8x128xf32>
    %18 = arith.maximumf %16, %17 : vector<8x128xf32>
    %c56 = arith.constant 56 : index
    %c0_13 = arith.constant 0 : index
    %19 = vector.load %arg2[%c56, %c0_13] : memref<240x128xf32, #tpu.memory_space<vmem>>, vector<16x8xf32>
    %cst_14 = arith.constant dense<0.000000e+00> : vector<16x128xf32>
    %20 = tpu.matmul %19, %18, %cst_14 {dimension_numbers = #tpu.dot_dimension_numbers<[1], [0], [0], [1], [0, 0, 1, 1], [], []>} : vector<16x8xf32>, vector<8x128xf32>, vector<16x128xf32> -> vector<16x128xf32>
    %c176 = arith.constant 176 : index
    %c0_15 = arith.constant 0 : index
    %21 = vector.load %arg2[%c176, %c0_15] : memref<240x128xf32, #tpu.memory_space<vmem>>, vector<16x128xf32>
    %22 = arith.addf %20, %21 : vector<16x128xf32>
    %23 = vector.extract_strided_slice %22 {offsets = [0, 0], sizes = [8, 128], strides = [1, 1]} : vector<16x128xf32> to vector<8x128xf32>
    %24 = vector.extract_strided_slice %22 {offsets = [8, 0], sizes = [8, 128], strides = [1, 1]} : vector<16x128xf32> to vector<8x128xf32>
    %c0_16 = arith.constant 0 : index
    %c0_17 = arith.constant 0 : index
    %25 = vector.load %arg1[%c0_16, %c0_17] : memref<8x128xf32, #tpu.memory_space<vmem>>, vector<8x128xf32>
    %cst_18 = arith.constant 5.000000e-01 : f32
    %26 = vector.broadcast %cst_18 : f32 to vector<8x128xf32>
    %27 = arith.mulf %26, %24 : vector<8x128xf32>
    %28 = math.exp %27 : vector<8x128xf32>
    %29 = arith.mulf %25, %28 : vector<8x128xf32>
    %30 = arith.addf %23, %29 : vector<8x128xf32>
    %c72 = arith.constant 72 : index
    %c0_19 = arith.constant 0 : index
    %31 = vector.load %arg2[%c72, %c0_19] : memref<240x128xf32, #tpu.memory_space<vmem>>, vector<32x8xf32>
    %cst_20 = arith.constant dense<0.000000e+00> : vector<32x128xf32>
    %32 = tpu.matmul %31, %30, %cst_20 {dimension_numbers = #tpu.dot_dimension_numbers<[1], [0], [0], [1], [0, 0, 1, 1], [], []>} : vector<32x8xf32>, vector<8x128xf32>, vector<32x128xf32> -> vector<32x128xf32>
    %c192 = arith.constant 192 : index
    %c0_21 = arith.constant 0 : index
    %33 = vector.load %arg2[%c192, %c0_21] : memref<240x128xf32, #tpu.memory_space<vmem>>, vector<32x128xf32>
    %34 = arith.addf %32, %33 : vector<32x128xf32>
    %cst_22 = arith.constant 0.000000e+00 : f32
    %35 = vector.broadcast %cst_22 : f32 to vector<32x128xf32>
    %36 = arith.maximumf %34, %35 : vector<32x128xf32>
    %c104 = arith.constant 104 : index
    %c0_23 = arith.constant 0 : index
    %37 = vector.load %arg2[%c104, %c0_23] : memref<240x128xf32, #tpu.memory_space<vmem>>, vector<16x32xf32>
    %cst_24 = arith.constant dense<0.000000e+00> : vector<16x128xf32>
    %38 = tpu.matmul %37, %36, %cst_24 {dimension_numbers = #tpu.dot_dimension_numbers<[1], [0], [0], [1], [0, 0, 1, 1], [], []>} : vector<16x32xf32>, vector<32x128xf32>, vector<16x128xf32> -> vector<16x128xf32>
    %c224 = arith.constant 224 : index
    %c0_25 = arith.constant 0 : index
    %39 = vector.load %arg2[%c224, %c0_25] : memref<240x128xf32, #tpu.memory_space<vmem>>, vector<16x128xf32>
    %40 = arith.addf %38, %39 : vector<16x128xf32>
    %41 = arith.negf %40 : vector<16x128xf32>
    %42 = math.exp %41 : vector<16x128xf32>
    %cst_26 = arith.constant 1.000000e+00 : f32
    %43 = vector.broadcast %cst_26 : f32 to vector<16x128xf32>
    %44 = arith.addf %43, %42 : vector<16x128xf32>
    %45 = arith.divf %43, %44 : vector<16x128xf32>
    %c0_27 = arith.constant 0 : index
    %c0_28 = arith.constant 0 : index
    %46 = vector.load %arg3[%c0_27, %c0_28] : memref<32x128xf32, #tpu.memory_space<vmem>>, vector<16x128xf32>
    tpu.vector_store %arg3[%c0_27, %c0_28], %45 {strides = array<i32>} : memref<32x128xf32, #tpu.memory_space<vmem>>, vector<16x128xf32>,
    %c16 = arith.constant 16 : index
    %c0_29 = arith.constant 0 : index
    %47 = vector.load %arg3[%c16, %c0_29] : memref<32x128xf32, #tpu.memory_space<vmem>>, vector<16x128xf32>
    tpu.vector_store %arg3[%c16, %c0_29], %22 {strides = array<i32>} : memref<32x128xf32, #tpu.memory_space<vmem>>, vector<16x128xf32>,
    return
  }
}

</mosaic_0001>

<bundles_post_ra>
// kernel: vae_forward.1
= control target key start
LH: loop header
LB: loop body
LE: loop exit
PB: predicated region body
PF: predicated region fallthrough
CT: control target
= control target key end

     0   :  { %8 = vsyncpa [#allocation3], 0  ;;  %s936_s12 = smov [#allocation2]   ;;  %s1090_s0 = inlined_call_operand.vmem [shape: f32[128,16], index: 0, kind: input, shape index: {}]   ;;  %s1091_s1 = inlined_call_operand.vmem [shape: f32[8,128], index: 1, kind: input, shape index: {}]   ;;  %s1092_s2 = inlined_call_operand.hbm [shape: f32[240,128], index: 2, kind: input, shape index: {}]   ;;  %s1093_s3 = inlined_call_operand.vmem [shape: f32[32,128], index: 3, kind: output, shape index: {}]  }
   0x1   :  { %s18_s13 = sshll.u32 %s936_s12, 4  ;;  %s912_s16 = scalar_lea.hbm %s1092_s2, 3840  ;;  %s19_s13 = int_to_ptr.vmem [resolvable:$true] %s18_s13 }
   0x2   :  { %p913_p0 = scmp.ne.s32.totalorder %s1092_s2, %s912_s16  ;;  %p916_p1 = scmp.lt.u32.totalorder %s912_s16, %s1092_s2 }
   0x4   :  { %p918_p2 = pnand %p916_p1, %p913_p0 }
   0x6   :  { %921 = shalt.err (!%p918_p2)
}
   0x7   :  { %s922_s21 = scalar_lea.vmem %s19_s13, 3840  ;;  %p927_p4 = scmp.lt.s32.totalorder %s19_s13, %s19_s13 }
   0x8   :  { %p923_p3 = scmp.ne.s32.totalorder %s19_s13, %s922_s21  ;;  %p928_p5 = scmp.lt.s32.totalorder %s922_s21, %s922_s21 }
   0xa   :  { %p929_p6 = por %p928_p5, %p927_p4 }
   0xc   :  { %p930_p7 = pnand %p929_p6, %p923_p3 }
   0xe   :  { %933 = shalt.err (!%p930_p7)
}
   0xf   :  { %s937_s22 = smov 128   ;;  %s938_s23 = smov 8  }
  0x10   :  { %24 = dma.hbm_to_vmem [thread:$0]  %s1092_s2, 3840, %s19_s13, [#allocation3], %s937_s22, %s937_s22, %s938_s23  }
  0x11   :  { %934 = dma.done.wait [#allocation3], 3840  }
  0x12   :  { %935 = vsyncadd [#allocation3], 4294963456  ;;  %vm52_vm0 = vcmask 130048   ;;  %v32_v1 = vld [vmem:[%s1090_s0] sm:$0xff]  ;;  %v33_v2 = vld [vmem:[%s1090_s0 + $0x8] sm:$0xff]  ;;  %vm206_vm2 = vcmask 261120  }
  0x13   :  { %vm976_vm1 = vmpackc.low %vm52_vm0, %vm52_vm0  ;;  %v34_v3 = vld [vmem:[%s1090_s0 + $0x10] sm:$0xff]  ;;  %v829_v4 = vpack.c.bf16 %v33_v2, %v32_v1  ;;  %v35_v5 = vld [vmem:[%s1090_s0 + $0x18] sm:$0xff]  ;;  %v939_v49 = vmov 0.0|0.0   ;;  %vm940_vm3 = vmmov 0   ;;  %v941_v50 = vmov 0.0  }
  0x14   :  { %v835_v6 = vpack.c.bf16 %v35_v5, %v34_v3  ;;  %v28_v7 = vld [vmem:[#allocation2] sm:$0xff]  ;;  %v37_v9 = vld [vmem:[%s1090_s0 + $0x28] sm:$0xff]  ;;  %v38_v11 = vld [vmem:[%s1090_s0 + $0x30] sm:$0xff]  ;;  %vm370_vm4 = vcmask 64512  }
  0x15   :  { %831 = vmatprep.subr.msk.bf16.mxu0 %vm976_vm1, %v829_v4  ;;  %v36_v8 = vld [vmem:[%s1090_s0 + $0x20] sm:$0xff]  ;;  %781 = vmatprep.mubr.msk.f32.mxu0 %vm52_vm0, %v28_v7  ;;  %v39_v12 = vld [vmem:[%s1090_s0 + $0x38] sm:$0xff]  ;;  %v41_v15 = vld [vmem:[%s1090_s0 + $0x48] sm:$0xff] }
  0x16   :  { %834 = vmatpush3.bf16.xpose.msk.msra.mxu0 %vm976_vm1, %v829_v4  ;;  %v841_v10 = vpack.c.bf16 %v37_v9, %v36_v8  ;;  %v847_v13 = vpack.c.bf16 %v39_v12, %v38_v11  ;;  %v40_v14 = vld [vmem:[%s1090_s0 + $0x40] sm:$0xff]  ;;  %v42_v17 = vld [vmem:[%s1090_s0 + $0x50] sm:$0xff]  ;;  %v43_v18 = vld [vmem:[%s1090_s0 + $0x58] sm:$0xff] }
  0x17   :  { %837 = vmatprep.subr.msk.bf16.mxu0 %vm976_vm1, %v835_v6  ;;  %v853_v16 = vpack.c.bf16 %v41_v15, %v40_v14  ;;  %v859_v19 = vpack.c.bf16 %v43_v18, %v42_v17  ;;  %v44_v20 = vld [vmem:[%s1090_s0 + $0x60] sm:$0xff]  ;;  %v45_v21 = vld [vmem:[%s1090_s0 + $0x68] sm:$0xff]  ;;  %v46_v23 = vld [vmem:[%s1090_s0 + $0x70] sm:$0xff] }
  0x18   :  { %v865_v22 = vpack.c.bf16 %v45_v21, %v44_v20  ;;  %v47_v24 = vld [vmem:[%s1090_s0 + $0x78] sm:$0xff]  ;;  %v29_v26 = vld [vmem:[#allocation2 + $0x8] sm:$0xff]  ;;  %v30_v27 = vld [vmem:[#allocation2 + $0x10] sm:$0xff] }
  0x19   :  { %v871_v25 = vpack.c.bf16 %v47_v24, %v46_v23  ;;  %v31_v28 = vld [vmem:[#allocation2 + $0x18] sm:$0xff]  ;;  %v202_v29 = vld [vmem:[#allocation2 + $0x20] sm:$0xff]  ;;  %v51_v36 = vld [vmem:[#allocation2 + $0x90] sm:$0xff] }
  0x1a   :  { %795 = vmatprep.mubr.msk.f32.mxu1 %vm206_vm2, %v202_v29  ;;  %v49_v30 = vld [vmem:[#allocation2 + $0x80] sm:$0xff]  ;;  %v48_v31 = vld [vmem:[#allocation2 + $0x78] sm:$0xff]  ;;  %v50_v38 = vld [vmem:[#allocation2 + $0x88] sm:$0xff] }
  0x1b   :  { %v203_v48 = vld [vmem:[#allocation2 + $0x28] sm:$0xff]  ;;  %v205_v51 = vld [vmem:[#allocation2 + $0xa0] sm:$0xff]  ;;  %v204_v52 = vld [vmem:[#allocation2 + $0x98] sm:$0xff] }
  0x1c   :  { %v290_v60 = vld [vmem:[#allocation2 + $0x30] sm:$0xff]  ;;  %v366_v61 = vld [vmem:[#allocation2 + $0x38] sm:$0xff]  ;;  %v291_v62 = vld [vmem:[#allocation2 + $0xa8] sm:$0xff] }
  0x1d   :  { %v367_v3 = vld [vmem:[#allocation2 + $0x40] sm:$0xff]  ;;  %v458_v4 = vld [vmem:[#allocation2 + $0x48] sm:$0xff]  ;;  %v369_v5 = vld [vmem:[#allocation2 + $0xb8] sm:$0xff] }
  0x1e   :  { %840 = vmatpush3.bf16.xpose.msk.msra.mxu0 %vm976_vm1, %v835_v6  ;;  %v368_v6 = vld [vmem:[#allocation2 + $0xb0] sm:$0xff]  ;;  %v460_v18 = vld [vmem:[#allocation2 + $0x58] sm:$0xff]  ;;  %v567_v20 = vld [vmem:[#allocation2 + $0x68] sm:$0xff] }
  0x1f   :  { %843 = vmatprep.subr.msk.bf16.mxu0 %vm976_vm1, %v841_v10  ;;  %v459_v17 = vld [vmem:[#allocation2 + $0x50] sm:$0xff]  ;;  %v463_v21 = vld [vmem:[#allocation2 + $0xc8] sm:$0xff] }
  0x20   :  { %v464_v29 = vld [vmem:[#allocation2 + $0xd0] sm:$0xff] }
  0x26   :  { %846 = vmatpush3.bf16.xpose.msk.msra.mxu0 %vm976_vm1, %v841_v10 }
  0x27   :  { %849 = vmatprep.subr.msk.bf16.mxu0 %vm976_vm1, %v847_v13 }
  0x2e   :  { %852 = vmatpush3.bf16.xpose.msk.msra.mxu0 %vm976_vm1, %v847_v13  ;;  %v452_v13 = vld [vmem:[%s1091_s1] sm:$0xff] }
  0x2f   :  { %855 = vmatprep.subr.msk.bf16.mxu0 %vm976_vm1, %v853_v16 }
  0x36   :  { %858 = vmatpush3.bf16.xpose.msk.msra.mxu0 %vm976_vm1, %v853_v16 }
  0x37   :  { %861 = vmatprep.subr.msk.bf16.mxu0 %vm976_vm1, %v859_v19 }
  0x3e   :  { %864 = vmatpush3.bf16.xpose.msk.msra.mxu0 %vm976_vm1, %v859_v19  ;;  %v461_v19 = vld [vmem:[#allocation2 + $0x60] sm:$0xff] }
  0x3f   :  { %867 = vmatprep.subr.msk.bf16.mxu0 %vm976_vm1, %v865_v22 }
  0x46   :  { %870 = vmatpush3.bf16.xpose.msk.msra.mxu0 %vm976_vm1, %v865_v22  ;;  %v462_v22 = vld [vmem:[#allocation2 + $0xc0] sm:$0xff] }
  0x47   :  { %873 = vmatprep.subr.msk.bf16.mxu0 %vm976_vm1, %v871_v25 }
  0x4e   :  { %876 = vmatpush3.bf16.xpose.msk.msra.mxu0 %vm976_vm1, %v871_v25 }
  0x55   :  { %782 = vmatmul.mubr.msk.f32.vlgmr.msra.gmra.mrb[0].mxu0 %vm52_vm0, %v29_v26 }
  0x56   :  { %784 = vmatprep.mubr.msk.f32.mxu0 %vm52_vm0, %v30_v27  ;;  %v465_v27 = vld [vmem:[#allocation2 + $0xd8] sm:$0xff] }
  0x59   :  { %785 = vmatmul.mubr.msk.f32.gmra.mrb[2].mxu0 %vm52_vm0, %v31_v28 }
 0x128   :  { %v783_v32 = vpop.f32.mrb[0].mxu0 }
 0x129   :  { %v185_v33 = vadd.f32 %v783_v32, %v49_v30  ;;  %v179_v34 = vpop.f32.mrb[1].mxu0 }
 0x12a   :  { %v180_v35 = vadd.f32 %v179_v34, %v48_v31 }
 0x12b   :  { %v199_v37 = vmax.f32 %v185_v33, 0.0 }
 0x12c   :  { %v198_v39 = vmax.f32 %v180_v35, 0.0  ;;  %v786_v40 = vpop.f32.mrb[2].mxu0 }
 0x12d   :  { %v195_v41 = vadd.f32 %v786_v40, %v51_v36  ;;  %v189_v42 = vpop.f32.mrb[3].mxu0  ;;  %v570_v40 = vld [vmem:[#allocation2 + $0xe8] sm:$0xff] }
 0x12e   :  { %v190_v43 = vadd.f32 %v189_v42, %v50_v38  ;;  %v877_v44 = vpack.c.bf16 %v199_v37, %v198_v39  ;;  %v568_v39 = vld [vmem:[#allocation2 + $0x70] sm:$0xff] }
 0x12f   :  { %v201_v45 = vmax.f32 %v195_v41, 0.0  ;;  %v569_v41 = vld [vmem:[#allocation2 + $0xe0] sm:$0xff] }
 0x130   :  { %v200_v46 = vmax.f32 %v190_v43, 0.0  ;;  %878 = vmatprep.subr.bf16.mxu1 %v877_v44 }
 0x131   :  { %880 = vmatpush3.bf16.msra.mxu1 %v877_v44 }
 0x132   :  { %v881_v47 = vpack.c.bf16 %v201_v45, %v200_v46 }
 0x134   :  { %882 = vmatprep.subr.bf16.mxu1 %v881_v47 }
 0x135   :  { %884 = vmatpush3.bf16.msra.mxu1 %v881_v47 }
 0x136   :  { %885 = vmatprep.subr.bf16.mxu1 %v939_v49 }
 0x138   :  { %796 = vmatmul.mubr.msk.f32.vlgmr.msra.gmra.mrb[0].mxu1 %vm206_vm2, %v203_v48 }
 0x139   :  { %802 = vmatprep.mubr.msk.f32.mxu1 %vm940_vm3, %v941_v50 }
 0x20b   :  { %v797_v53 = vpop.f32.mrb[0].mxu1 }
 0x20c   :  { %v285_v54 = vadd.f32 %v797_v53, %v205_v51  ;;  %v279_v55 = vpop.f32.mrb[1].mxu1 }
 0x20d   :  { %v280_v56 = vadd.f32 %v279_v55, %v204_v52 }
 0x20e   :  { %v289_v57 = vmax.f32 %v285_v54, 0.0 }
 0x20f   :  { %v288_v58 = vmax.f32 %v280_v56, 0.0 }
 0x211   :  { %v886_v59 = vpack.c.bf16 %v289_v57, %v288_v58 }
 0x213   :  { %887 = vmatpush3.bf16.msra.mxu1 %v886_v59 }
 0x216   :  { %803 = vmatmul.mubr.msk.f32.vlgmr.msra.gmra.mrb[2].mxu1 %vm52_vm0, %v290_v60 }
 0x217   :  { %807 = vmatprep.mubr.msk.f32.mxu1 %vm370_vm4, %v366_v61 }
 0x2e9   :  { %v361_v63 = vpop.f32.mrb[2].mxu1 }
 0x2ea   :  { %v362_v0 = vadd.f32 %v361_v63, %v291_v62  ;;  %v804_v1 = vpop.f32.mrb[3].mxu1 }
 0x2ec   :  { %v365_v2 = vmax.f32 %v362_v0, 0.0 }
 0x2ee   :  { %805 = vmatprep.subr.mxu1 %v365_v2 }
 0x2ef   :  { %806 = vmatpush3.msra.mxu1 %v365_v2 }
 0x2f0   :  { %808 = vmatmul.mubr.msk.f32.vlgmr.msra.gmra.mrb[4].mxu1 %vm370_vm4, %v367_v3 }
 0x2f1   :  { %812 = vmatprep.mubr.msk.f32.mxu1 %vm370_vm4, %v458_v4 }
 0x3c3   :  { %v809_v7 = vpop.f32.mrb[4].mxu1 }
 0x3c4   :  { %v449_v8 = vadd.f32 %v809_v7, %v369_v5  ;;  %v443_v9 = vpop.f32.mrb[5].mxu1 }
 0x3c5   :  { %v444_v10 = vadd.f32 %v443_v9, %v368_v6 }
 0x3c6   :  { %v453_v11 = vmul.f32 0.5, %v449_v8  ;;  %667 = vst [vmem:[%s1093_s3 + $0x18] sm:$0xff] %v449_v8 }
 0x3c7   :  { %666 = vst [vmem:[%s1093_s3 + $0x10] sm:$0xff] %v444_v10 }
 0x3c8   :  { %v454_v12 = vmul.f32 1.442695, %v453_v11 }
 0x3ca   :  { %902 = vpow2.f32 %v454_v12 }
 0x3d4   :  { %v903_v14 = vpop.eup %902 }
 0x3d5   :  { %v456_v15 = vmul.f32 %v903_v14, %v452_v13 }
 0x3d7   :  { %v457_v16 = vadd.f32 %v456_v15, %v444_v10 }
 0x3d9   :  { %810 = vmatprep.subr.mxu1 %v457_v16 }
 0x3da   :  { %811 = vmatpush3.msra.mxu1 %v457_v16 }
 0x3db   :  { %813 = vmatmul.mubr.msk.f32.vlgmr.msra.gmra.mrb[6].mxu1 %vm370_vm4, %v459_v17 }
 0x3dc   :  { %815 = vmatprep.mubr.msk.f32.mxu1 %vm370_vm4, %v460_v18 }
 0x3df   :  { %816 = vmatmul.mubr.msk.f32.gmra.mrb[8].mxu1 %vm370_vm4, %v461_v19 }
 0x3e0   :  { %826 = vmatprep.mubr.msk.f32.mxu1 %vm206_vm2, %v567_v20 }
 0x4ae   :  { %v814_v23 = vpop.f32.mrb[6].mxu1 }
 0x4af   :  { %v550_v24 = vadd.f32 %v814_v23, %v463_v21  ;;  %v544_v25 = vpop.f32.mrb[7].mxu1 }
 0x4b0   :  { %v545_v26 = vadd.f32 %v544_v25, %v462_v22 }
 0x4b1   :  { %v564_v28 = vmax.f32 %v550_v24, 0.0 }
 0x4b2   :  { %v563_v30 = vmax.f32 %v545_v26, 0.0  ;;  %v817_v31 = vpop.f32.mrb[8].mxu1 }
 0x4b3   :  { %v560_v32 = vadd.f32 %v817_v31, %v465_v27  ;;  %v554_v33 = vpop.f32.mrb[9].mxu1 }
 0x4b4   :  { %v888_v34 = vpack.c.bf16 %v564_v28, %v563_v30  ;;  %v555_v35 = vadd.f32 %v554_v33, %v464_v29 }
 0x4b5   :  { %v566_v36 = vmax.f32 %v560_v32, 0.0 }
 0x4b6   :  { %v565_v37 = vmax.f32 %v555_v35, 0.0  ;;  %889 = vmatprep.subr.bf16.mxu1 %v888_v34 }
 0x4b7   :  { %891 = vmatpush3.bf16.msra.mxu1 %v888_v34 }
 0x4b8   :  { %v892_v38 = vpack.c.bf16 %v566_v36, %v565_v37 }
 0x4ba   :  { %893 = vmatprep.subr.bf16.mxu1 %v892_v38 }
 0x4bb   :  { %895 = vmatpush3.bf16.msra.mxu1 %v892_v38 }
 0x4be   :  { %827 = vmatmul.mubr.msk.f32.vlgmr.msra.gmra.mrb[10].mxu1 %vm206_vm2, %v568_v39 }
 0x591   :  { %v828_v42 = vpop.f32.mrb[10].mxu1 }
 0x592   :  { %v649_v43 = vadd.f32 %v828_v42, %v570_v40  ;;  %v643_v44 = vpop.f32.mrb[11].mxu1 }
 0x593   :  { %v644_v45 = vadd.f32 %v643_v44, %v569_v41 }
 0x594   :  { %v705_v46 = vmul.f32 -1.442695, %v649_v43 }
 0x595   :  { %v704_v47 = vmul.f32 -1.442695, %v644_v45 }
 0x596   :  { %904 = vpow2.f32 %v705_v46 }
 0x597   :  { %906 = vpow2.f32 %v704_v47 }
 0x5a0   :  { %v905_v48 = vpop.eup %904 }
 0x5a1   :  { %v907_v49 = vpop.eup %906  ;;  %v659_v50 = vadd.f32 1.0, %v905_v48 }
 0x5a2   :  { %v658_v51 = vadd.f32 1.0, %v907_v49 }
 0x5a3   :  { %908 = vrcp.f32 %v659_v50 }
 0x5a4   :  { %910 = vrcp.f32 %v658_v51 }
 0x5ad   :  { %v909_v52 = vpop.eup %908 }
 0x5ae   :  { %v911_v53 = vpop.eup %910  ;;  %665 = vst [vmem:[%s1093_s3 + $0x8] sm:$0xff] %v909_v52 }
 0x5af   :  { %664 = vst [vmem:[%s1093_s3] sm:$0xff] %v911_v53 }
 0x5b0   :  { %672 = vsyncpa [#allocation3], 1 }

</bundles_post_ra>
